<compile_context>
chip_gen: v5e
topology: v5e:2x2
jax: 0.10.0
libtpu: 0.0.40
codegen_flags: <defaults>
</compile_context>

<pallas_src>
import dataclasses

import jax
import jax.numpy as jnp
from jax.experimental import pallas as pl
from jax.experimental.pallas import tpu as pltpu

_LANE = 128
_SUBLANE = 8


def _round_up(x: int, m: int) -> int:
    return ((x + m - 1) // m) * m


def _vmem_cap_bytes() -> int:
    """Per-generation scoped-VMEM cap: <=0.75 * capacity, never above 96 MiB."""
    try:
        cap = int(pltpu.get_tpu_info().vmem_capacity_bytes)
    except Exception:
        cap = 64 * 1024 * 1024  # conservative fallback = v7x per-TensorCore VMEM
    return min(int(0.75 * cap), 96 * 1024 * 1024)


# ----------------------------------------------------------------------------
# Kernels
# ----------------------------------------------------------------------------
def _fc_single_step_kernel(x_ref, w_ref, b_ref, o_ref):
    """One (tm, tn) output tile, full K in a single step (common case).

    No accumulator scratch / pl.when phases: dot -> +bias -> store.
    """
    acc = jnp.dot(x_ref[...], w_ref[...], preferred_element_type=jnp.float32)
    o_ref[...] = (acc + b_ref[...]).astype(o_ref.dtype)


def _fc_k_accum_kernel(x_ref, w_ref, b_ref, o_ref, acc_ref):
    """One (tm, tn) output tile, reduction over the trailing K grid axis."""
    k = pl.program_id(2)

    @pl.when(k == 0)
    def _():
        acc_ref[...] = jnp.zeros_like(acc_ref)

    acc_ref[...] += jnp.dot(
        x_ref[...], w_ref[...], preferred_element_type=jnp.float32
    )

    @pl.when(k == pl.num_programs(2) - 1)
    def _():
        o_ref[...] = (acc_ref[...] + b_ref[...]).astype(o_ref.dtype)


# ----------------------------------------------------------------------------
# Parameter preparation (hoisted out of the per-call path)
# ----------------------------------------------------------------------------
@dataclasses.dataclass(frozen=True)
class DecoderParams:
    wp: jax.Array          # (Kp, Np) padded weight (W^T), compute_dtype
    bp: jax.Array          # (1, Np) f32 bias
    K: int
    N: int
    Kp: int
    Np: int
    tk: int
    tn: int
    compute_dtype: object
    vmem_cap: int


def prepare_decoder_params(w_t, b, *, compute_dtype=jnp.bfloat16) -> DecoderParams:
    """Pad / cast the Linear(K, N) parameters ONCE (not on every forward).

    w_t: (K, N) -- transpose of the PyTorch nn.Linear weight
    b:   (N,)
    """
    K, N = w_t.shape
    assert b.shape == (N,)
    vmem_cap = _vmem_cap_bytes()
    isz = jnp.dtype(compute_dtype).itemsize

    # --- N (lane) axis --------------------------------------------------------
    # Small N: keep the full unpadded dim as the block's last dim (full-dim
    # exception).  Padding N=10 -> 128 would inflate the dominant W stream
    # ~12.8x; masked stores on the tiny output are negligible.
    if N <= _LANE:
        tn, Np = N, N
    else:
        tn = _LANE                      # >=2 N-blocks engages both v7x TCs
        Np = _round_up(N, tn)

    # --- K axis ---------------------------------------------------------------
    # X tile is tiny (tm*tk), so a big tk is free VMEM-wise; it cuts the number
    # of K grid steps (~0.35us each) and issues larger DMAs of the W stream.
    k_cap = 2048
    if K <= k_cap:
        tk, Kp = K, K                   # single reduction step (common case)
    else:
        tk = k_cap
        Kp = _round_up(K, tk)

    # VMEM sanity (worst-case tm = 256, real itemsizes); shrink tk if needed.
    def _est(tk_, multi):
        e = (2 * 256 * tk_ * isz       # X double-buffer
             + 2 * tk_ * tn * isz      # W double-buffer
             + 2 * tn * 4              # bias double-buffer
             + 2 * 256 * tn * 4)       # out double-buffer (f32)
        if multi:
            e += 256 * tn * 4          # accumulator scratch
        return e

    while _est(tk, Kp > tk) > vmem_cap and tk > _LANE:
        tk = max(_LANE, _round_up(tk // 2, _LANE))
        Kp = _round_up(K, tk)

    # --- pad + cast (once) ------------------------------------------------------
    if (Kp, Np) == (K, N):
        wp = w_t.astype(compute_dtype)
    else:
        wp = (jnp.zeros((Kp, Np), compute_dtype)
              .at[:K, :N].set(w_t.astype(compute_dtype)))
    bp = jnp.zeros((1, Np), jnp.float32).at[0, :N].set(b.astype(jnp.float32))

    return DecoderParams(wp=wp, bp=bp, K=K, N=N, Kp=Kp, Np=Np, tk=tk, tn=tn,
                         compute_dtype=compute_dtype, vmem_cap=vmem_cap)


# ----------------------------------------------------------------------------
# Forward
# ----------------------------------------------------------------------------
def decoder_forward(concatenated_features, params: DecoderParams):
    """Decoder.forward: Flatten() -> Linear(K, number_class)."""
    B = concatenated_features.shape[0]
    x2d = concatenated_features.reshape(B, -1)          # Flatten() (free reshape)
    M, K = x2d.shape
    assert K == params.K, "flattened feature dim must match Linear input dim"
    out_dtype = x2d.dtype

    # --- M (sublane) axis ------------------------------------------------------
    tm = _round_up(min(M, 256), _SUBLANE)
    Mp = _round_up(M, tm)

    # --- activations: cast, pad only if required (fast path when aligned) -------
    xc = x2d if x2d.dtype == params.compute_dtype else x2d.astype(params.compute_dtype)
    if (Mp, params.Kp) == (M, K):
        xp = xc
    else:
        xp = (jnp.zeros((Mp, params.Kp), params.compute_dtype)
              .at[:M, :K].set(xc))

    tk, tn, Kp, Np = params.tk, params.tn, params.Kp, params.Np
    n_m, n_n, n_k = Mp // tm, Np // tn, Kp // tk
    multi_k = n_k > 1

    isz = jnp.dtype(params.compute_dtype).itemsize
    oitem = jnp.dtype(out_dtype).itemsize

    vmem_est = (2 * tm * tk * isz + 2 * tk * tn * isz + 2 * tn * 4
                + 2 * tm * tn * oitem + (tm * tn * 4 if multi_k else 0))
    vmem_limit = int(min(max(2 * vmem_est, 8 * 1024 * 1024), params.vmem_cap))

    # Advisory scheduling hint: padded shapes, real itemsizes, re-reads per tile.
    cost = pl.CostEstimate(
        flops=2 * Mp * Kp * Np,
        transcendentals=0,
        bytes_accessed=(n_n * Mp * Kp * isz + n_m * Kp * Np * isz
                        + Np * 4 + Mp * Np * oitem),
    )

    if not multi_k:
        out_p = pl.pallas_call(
            _fc_single_step_kernel,
            out_shape=jax.ShapeDtypeStruct((Mp, Np), out_dtype),
            grid_spec=pltpu.PrefetchScalarGridSpec(
                num_scalar_prefetch=0,
                grid=(n_m, n_n),
                in_specs=[
                    pl.BlockSpec((tm, tk), lambda i, j: (i, 0)),   # X row tile
                    pl.BlockSpec((tk, tn), lambda i, j: (0, j)),   # W tile
                    pl.BlockSpec((1, tn), lambda i, j: (0, j)),    # bias tile
                ],
                out_specs=pl.BlockSpec((tm, tn), lambda i, j: (i, j)),
            ),
            compiler_params=pltpu.CompilerParams(
                dimension_semantics=("parallel", "parallel"),
                vmem_limit_bytes=vmem_limit,
            ),
            cost_estimate=cost,
        )(xp, params.wp, params.bp)
    else:
        out_p = pl.pallas_call(
            _fc_k_accum_kernel,
            out_shape=jax.ShapeDtypeStruct((Mp, Np), out_dtype),
            grid_spec=pltpu.PrefetchScalarGridSpec(
                num_scalar_prefetch=0,
                grid=(n_m, n_n, n_k),
                in_specs=[
                    pl.BlockSpec((tm, tk), lambda i, j, k: (i, k)),
                    pl.BlockSpec((tk, tn), lambda i, j, k: (k, j)),
                    pl.BlockSpec((1, tn), lambda i, j, k: (0, j)),
                ],
                out_specs=pl.BlockSpec((tm, tn), lambda i, j, k: (i, j)),
                scratch_shapes=[pltpu.VMEM((tm, tn), jnp.float32)],
            ),
            compiler_params=pltpu.CompilerParams(
                dimension_semantics=("parallel", "parallel", "arbitrary"),
                vmem_limit_bytes=vmem_limit,
            ),
            cost_estimate=cost,
        )(xp, params.wp, params.bp)

    if (Mp, Np) != (M, params.N):
        out_p = out_p[:M, :params.N]
    return out_p


def reference_f32(concatenated_features, w_t, b):
    x2d = concatenated_features.reshape(concatenated_features.shape[0], -1)
    return x2d @ w_t + b


def reference_bf16(concatenated_features, w_t, b):
    x2d = concatenated_features.reshape(concatenated_features.shape[0], -1)
    xb = x2d.astype(jnp.bfloat16).astype(jnp.float32)
    wb = w_t.astype(jnp.bfloat16).astype(jnp.float32)
    return xb @ wb + b


if __name__ == "__main__":
    # Decoder(number_class, num_of_sensor_channels, num_modalities, filter_num)
    number_class = 10
    num_of_sensor_channels = 4
    num_modalities = 2
    filter_num = 16
    B = 2
    K = 2 * filter_num * num_of_sensor_channels * num_modalities   # 256

    key = jax.random.PRNGKey(0)
    k1, k2, k3 = jax.random.split(key, 3)
    # Concatenated features: (B, modalities, channels, 2*filter_num) -> flatten to K.
    concatenated_features = jax.random.normal(
        k1, (B, num_modalities, num_of_sensor_channels, 2 * filter_num),
        dtype=jnp.float32)
    # Synthetic Linear(K, number_class) params; w_t is W^T, shape (K, N).
    w_t = jax.random.normal(k2, (K, number_class), dtype=jnp.float32) * (1.0 / jnp.sqrt(K))
    b = jax.random.normal(k3, (number_class,), dtype=jnp.float32) * 0.01

    # Padding / casting of parameters is done ONCE, outside the hot path.
    params = prepare_decoder_params(w_t, b, compute_dtype=jnp.bfloat16)

    out = decoder_forward(concatenated_features, params)
    out = jax.block_until_ready(out)

    assert out.shape == (B, number_class)
    # Exact-math reference for what the kernel computes (bf16 inputs, f32 accum):
    ref_b = reference_bf16(concatenated_features, w_t, b)
    assert jnp.allclose(out, ref_b, atol=1e-3, rtol=1e-3), "mismatch vs bf16 reference"
    # Module-level f32 semantics (bf16 input quantization tolerance):
    ref_f = reference_f32(concatenated_features, w_t, b)
    assert jnp.allclose(out, ref_f, atol=5e-2, rtol=5e-2), "mismatch vs f32 reference"
    print("KERNEL_OK")
</pallas_src>

<mosaic_0001>
module attributes {stable_mosaic.version = 11 : i64} {
  func.func @_fc_single_step_kernel(%arg0: i32, %arg1: i32, %arg2: memref<8x256xbf16, #tpu.memory_space<vmem>>, %arg3: memref<256x10xbf16, #tpu.memory_space<vmem>>, %arg4: memref<1x10xf32, #tpu.memory_space<vmem>>, %arg5: memref<8x10xf32, #tpu.memory_space<vmem>>) attributes {dimension_semantics = [#tpu.dimension_semantics<parallel>, #tpu.dimension_semantics<parallel>], iteration_bounds = array<i64: 1, 1>, scalar_prefetch = 0 : i64, scratch_operands = 0 : i64, tpu.core_type = #tpu.core_type<tc>, window_params = [{transform_indices = @transform_0, window_bounds = array<i64: 8, 256>}, {transform_indices = @transform_1, window_bounds = array<i64: 256, 10>}, {transform_indices = @transform_2, window_bounds = array<i64: 1, 10>}, {transform_indices = @transform_3, window_bounds = array<i64: 8, 10>}]} {
    %c0 = arith.constant 0 : index
    %c0_0 = arith.constant 0 : index
    %0 = vector.load %arg2[%c0, %c0_0] : memref<8x256xbf16, #tpu.memory_space<vmem>>, vector<8x256xbf16>
    %c0_1 = arith.constant 0 : index
    %c0_2 = arith.constant 0 : index
    %1 = vector.load %arg3[%c0_1, %c0_2] : memref<256x10xbf16, #tpu.memory_space<vmem>>, vector<256x10xbf16>
    %cst = arith.constant dense<0.000000e+00> : vector<8x10xf32>
    %2 = tpu.matmul %0, %1, %cst {dimension_numbers = #tpu.dot_dimension_numbers<[1], [0], [0], [1], [0, 0, 1, 1], [], []>} : vector<8x256xbf16>, vector<256x10xbf16>, vector<8x10xf32> -> vector<8x10xf32>
    %c0_3 = arith.constant 0 : index
    %c0_4 = arith.constant 0 : index
    %3 = vector.load %arg4[%c0_3, %c0_4] : memref<1x10xf32, #tpu.memory_space<vmem>>, vector<1x10xf32>
    %4 = vector.broadcast %3 : vector<1x10xf32> to vector<8x10xf32>
    %5 = arith.addf %2, %4 : vector<8x10xf32>
    %c0_5 = arith.constant 0 : index
    %c0_6 = arith.constant 0 : index
    %6 = vector.load %arg5[%c0_5, %c0_6] : memref<8x10xf32, #tpu.memory_space<vmem>>, vector<8x10xf32>
    tpu.vector_store %arg5[%c0_5, %c0_6], %5 {strides = array<i32>} : memref<8x10xf32, #tpu.memory_space<vmem>>, vector<8x10xf32>,
    return
  }
  func.func @transform_0(%arg0: i32, %arg1: i32) -> (i32, i32) {
    %c0_i32 = arith.constant 0 : i32
    %c0_i32_0 = arith.constant 0 : i32
    return %arg0, %c0_i32 : i32, i32
  }
  func.func @transform_1(%arg0: i32, %arg1: i32) -> (i32, i32) {
    %c0_i32 = arith.constant 0 : i32
    %c0_i32_0 = arith.constant 0 : i32
    return %c0_i32, %arg1 : i32, i32
  }
  func.func @transform_2(%arg0: i32, %arg1: i32) -> (i32, i32) {
    %c0_i32 = arith.constant 0 : i32
    %c0_i32_0 = arith.constant 0 : i32
    return %c0_i32, %arg1 : i32, i32
  }
  func.func @transform_3(%arg0: i32, %arg1: i32) -> (i32, i32) {
    %c0_i32 = arith.constant 0 : i32
    return %arg0, %arg1 : i32, i32
  }
}

</mosaic_0001>

<bundles_post_ra>
// kernel: tpu_custom_call.1
= control target key start
LH: loop header
LB: loop body
LE: loop exit
PB: predicated region body
PF: predicated region fallthrough
CT: control target
= control target key end

     0   :  { %s385_s0 = inlined_call_operand.vmem [shape: bf16[8,256], index: 0, kind: input, shape index: {}]   ;;  %s386_s1 = inlined_call_operand.vmem [shape: bf16[256,10], index: 1, kind: input, shape index: {}]   ;;  %s387_s2 = inlined_call_operand.vmem [shape: f32[1,10], index: 2, kind: input, shape index: {}]   ;;  %s388_s3 = inlined_call_operand.hbm [shape: f32[8,10], index: 3, kind: output, shape index: {}]  }
   0x1   :  { %v270_v0 = vld [vmem:[%s386_s1 + $0x38] sm:$0xff]  ;;  %v269_v2 = vld [vmem:[%s386_s1 + $0x30] sm:$0xff]  ;;  %v268_v4 = vld [vmem:[%s386_s1 + $0x28] sm:$0xff] }
   0x2   :  { %v278_v1 = vld [vmem:[%s386_s1 + $0x78] sm:$0xff]  ;;  %155 = vmatpush.bf16.msra.mxu0 %v270_v0  ;;  %v277_v3 = vld [vmem:[%s386_s1 + $0x70] sm:$0xff]  ;;  %v276_v5 = vld [vmem:[%s386_s1 + $0x68] sm:$0xff] }
   0x3   :  { %168 = vmatpush.bf16.msra.mxu1 %v278_v1 }
   0x6   :  { %156 = vmatpush.bf16.msra.mxu0 %v269_v2 }
   0x7   :  { %169 = vmatpush.bf16.msra.mxu1 %v277_v3 }
   0x8   :  { %8 = vsyncpa [#allocation3], 0  ;;  %v267_v6 = vld [vmem:[%s386_s1 + $0x20] sm:$0xff]  ;;  %v266_v8 = vld [vmem:[%s386_s1 + $0x18] sm:$0xff]  ;;  %s307_s20 = smov [#allocation2]   ;;  %s190_s24 = sshll.u32 %s388_s3, 4  ;;  %s191_s24 = int_to_ptr.hbm [resolvable:$true] %s190_s24 }
   0x9   :  { %v275_v7 = vld [vmem:[%s386_s1 + $0x60] sm:$0xff]  ;;  %v274_v9 = vld [vmem:[%s386_s1 + $0x58] sm:$0xff]  ;;  %v265_v10 = vld [vmem:[%s386_s1 + $0x10] sm:$0xff]  ;;  %s188_s21 = sshll.u32 %s307_s20, 4  ;;  %vm181_vm0 = vcmask 80896   ;;  %s189_s21 = int_to_ptr.vmem [resolvable:$true] %s188_s21 }
   0xa   :  { %157 = vmatpush.bf16.msra.mxu0 %v268_v4  ;;  %v273_v11 = vld [vmem:[%s386_s1 + $0x50] sm:$0xff]  ;;  %v264_v12 = vld [vmem:[%s386_s1 + $0x8] sm:$0xff]  ;;  %v15_v14 = vld [vmem:[%s385_s0] sm:$0xff] }
   0xb   :  { %170 = vmatpush.bf16.msra.mxu1 %v276_v5  ;;  %v272_v13 = vld [vmem:[%s386_s1 + $0x48] sm:$0xff]  ;;  %v53_v15 = vunpack.c.l.b16 %v15_v14  ;;  %v54_v16 = vunpack.c.h.b16 %v15_v14  ;;  %v263_v17 = vld [vmem:[%s386_s1] sm:$0xff] }
   0xc   :  { %v271_v18 = vld [vmem:[%s386_s1 + $0x40] sm:$0xff] }
   0xd   :  { %v55_v19 = vpack.c.b16 %v53_v15, %v53_v15  ;;  %v56_v20 = vpack.c.b16 %v54_v16, %v54_v16  ;;  %v280_v21 = vld [vmem:[%s387_s2] ss:$0 sm:$0xff] }
   0xe   :  { %158 = vmatpush.bf16.msra.mxu0 %v267_v6 }
   0xf   :  { %171 = vmatpush.bf16.msra.mxu1 %v275_v7 }
  0x12   :  { %159 = vmatpush.bf16.msra.mxu0 %v266_v8 }
  0x13   :  { %172 = vmatpush.bf16.msra.mxu1 %v274_v9 }
  0x16   :  { %160 = vmatpush.bf16.msra.mxu0 %v265_v10 }
  0x17   :  { %173 = vmatpush.bf16.msra.mxu1 %v273_v11 }
  0x1a   :  { %161 = vmatpush.bf16.msra.mxu0 %v264_v12 }
  0x1b   :  { %174 = vmatpush.bf16.msra.mxu1 %v272_v13 }
  0x1e   :  { %162 = vmatpush.bf16.msra.mxu0 %v263_v17 }
  0x1f   :  { %175 = vmatpush.bf16.msra.mxu1 %v271_v18 }
  0x21   :  { %163 = vmatmul.bf16.vlgmr.msra.gmra.mxu0 %v55_v19 }
  0x22   :  { %176 = vmatmul.bf16.vlgmr.msra.gmra.mxu1 %v56_v20 }
  0x9e   :  { %v164_v22 = vpop.f32.mrf.mxu0 }
  0x9f   :  { %v177_v23 = vpop.f32.mrf.mxu1  ;;  %v165_v24 = vadd.f32 %v280_v21, %v164_v22 }
  0xa1   :  { %v178_v25 = vadd.f32 %v177_v23, %v165_v24 }
  0xa3   :  { %182 = vst.msk [vmem:[#allocation2] sm:$0xff] %vm181_vm0, %v178_v25 }
  0xa4   :  { %193 = dma.vmem_to_hbm [thread:$0]  %s189_s21, 128, %s191_s24, [#allocation3]  }
  0xa6   :  { %v166_v26 = vpop.f32.mrf.mxu0 }
  0xa7   :  { %v179_v27 = vpop.f32.mrf.mxu1 }
  0xa8   :  { %305 = dma.done.wait [#allocation3], 128  }
  0xa9   :  { %306 = vsyncadd [#allocation3], 4294967168 }
  0xaa   :  { %198 = vsyncpa [#allocation3], 1 }

</bundles_post_ra>
